<compile_context>
chip_gen: v5e
topology: v5e:2x2
jax: 0.10.0
libtpu: 0.0.40
codegen_flags: <defaults>
</compile_context>

<pallas_src>
import functools

import jax
import jax.numpy as jnp
from jax.experimental import pallas as pl
from jax.experimental.pallas import tpu as pltpu

_LANE = 128             # lane tile (last dim)
_ROW_ALIGN = 32         # int8 sublane tile -> keep block rows a multiple of 32
_MAX_BLOCK_ROWS = 4096  # ~2.6 MiB of streams / step; ~5 MiB double-buffered


def _round_up(x, m):
    return (x + m - 1) // m * m


def _focal_loss_kernel(x_ref, sel_ref, out_ref, *,
                       gamma, alpha0, alpha1, use_alpha, inv_norm,
                       rows, block_rows, steps, tail):
    i = pl.program_id(0)

    @pl.when(i == 0)
    def _():
        out_ref[...] = jnp.zeros_like(out_ref)   # output-resident accumulator

    lp = x_ref[...].astype(jnp.float32)          # (block_rows, 128) log-probs
    keep = sel_ref[...] != 0                     # one-hot class selection

    pt = jnp.exp(lp)                             # EUP (free slot)

    # Element class == parity of its flat index == lane parity (128 is even).
    # Fold the leading -1 of the loss into the (1, 128) alpha pattern.
    if use_alpha:
        lane = jax.lax.broadcasted_iota(jnp.int32, (1, _LANE), 1)
        odd = (lane % 2).astype(jnp.float32)                 # 0 even / 1 odd
        neg_alpha = -(alpha0 + odd * (alpha1 - alpha0))      # -(alpha[class])
        neg_logpt = lp * neg_alpha                           # -(alpha_c * logpt)
    else:
        neg_logpt = -lp

    g = float(gamma)
    if g == 0.0:
        # (1 - pt) ** 0 == 1, matching torch pow(0, 0) == 1 even when pt == 1.
        loss = neg_logpt
    elif g.is_integer() and 0.0 < g <= 16.0:
        # Integer gamma: exponentiation-by-squaring, VPU only (no log/exp).
        omp = 1.0 - pt
        gi, base, focal = int(g), omp, None
        while gi:
            if gi & 1:
                focal = base if focal is None else focal * base
            gi >>= 1
            if gi:
                base = base * base
        loss = focal * neg_logpt
    else:
        # General float gamma.  NaN for pt > 1 (i.e. non-log-prob input),
        # matching torch.pow; unselected elements are shielded by the where.
        loss = ((1.0 - pt) ** g) * neg_logpt

    def _accumulate(valid):
        contrib = jnp.where(valid, loss, 0.0)
        # (block_rows, 128) -> (block_rows//8, 8, 128) keeps every (8, 128)
        # tile intact: the axis-0 sum is pure VPU adds into the resident
        # (8, 128) output block (no per-step cross-lane reduce, tiny RMW).
        out_ref[...] += contrib.reshape(block_rows // 8, 8, _LANE).sum(axis=0)

    if tail:
        # Only the final (partial) block can contain out-of-bounds garbage
        # rows; steady-state steps skip the row-bound mask entirely.
        @pl.when(i == steps - 1)
        def _():
            grow = jax.lax.broadcasted_iota(jnp.int32, (block_rows, _LANE), 0)
            _accumulate(jnp.logical_and(keep, grow + i * block_rows < rows))

        @pl.when(i != steps - 1)
        def _():
            _accumulate(keep)
    else:
        # Zero-padded inputs carry sel == 0, so no extra masking is needed.
        _accumulate(keep)

    if inv_norm != 1.0:
        @pl.when(i == steps - 1)
        def _():
            out_ref[...] = out_ref[...] * inv_norm


def focal_loss(x, target, *, gamma=0.0, alpha=None, size_average=True):
    """Pallas implementation of FocalLoss.forward (2-class pairing)."""
    if x.ndim > 2:
        flat = x.reshape(-1)     # .view(-1, 2): consecutive elems pair as classes
    else:
        # TODO(synk): a 2-D input with C > 2 classes would need a C-way gather.
        assert x.shape[-1] == 2, "kernel implements the 2-class focal loss"
        flat = x.reshape(-1)
    tgt = target.reshape(-1)

    two_n = flat.shape[0]
    n_pairs = two_n // 2
    assert two_n == 2 * tgt.shape[0], "target must view to (-1, 1) with N rows"

    # alpha handling, mirroring the torch __init__
    if isinstance(alpha, (float, int)) and not isinstance(alpha, bool):
        alpha_pair, use_alpha = (float(alpha), 1.0 - float(alpha)), True
    elif isinstance(alpha, (list, tuple)):
        alpha_pair, use_alpha = (float(alpha[0]), float(alpha[1])), True
    else:
        alpha_pair, use_alpha = (1.0, 1.0), False

    # Per-element one-hot selection over the interleaved (class0, class1)
    # stream: sel[2p] = (t_p == 0), sel[2p+1] = (t_p == 1).  This is the only
    # wrapper-side materialization (2N int8); the f32 log-prob stream is fed
    # to the kernel untouched.  NOTE: target values outside {0, 1} give zero
    # weight to both elements of their pair (torch's gather would raise).
    sel = jnp.stack([tgt == 0, tgt == 1], axis=-1).astype(jnp.int8).reshape(-1)

    rows = pl.cdiv(two_n, _LANE)
    lane_pad = rows * _LANE - two_n
    if lane_pad:
        # Rare path (two_n not a multiple of 128): one extra copy for the pad.
        flat = jnp.pad(flat, (0, lane_pad))
        sel = jnp.pad(sel, (0, lane_pad))   # sel == 0 -> padded elems add 0
    xm = flat.reshape(rows, _LANE)          # native dtype; cast in-kernel
    selm = sel.reshape(rows, _LANE)

    block_rows = min(_MAX_BLOCK_ROWS, _round_up(rows, _ROW_ALIGN))
    steps = pl.cdiv(rows, block_rows)
    tail = steps * block_rows != rows       # partial last block -> mask it

    kernel = functools.partial(
        _focal_loss_kernel,
        gamma=float(gamma),
        alpha0=alpha_pair[0],
        alpha1=alpha_pair[1],
        use_alpha=use_alpha,
        inv_norm=(1.0 / float(max(n_pairs, 1))) if size_average else 1.0,
        rows=rows,
        block_rows=block_rows,
        steps=steps,
        tail=tail,
    )

    in_spec = pl.BlockSpec((block_rows, _LANE), lambda i: (i, 0))
    out = pl.pallas_call(
        kernel,
        out_shape=jax.ShapeDtypeStruct((8, _LANE), jnp.float32),
        grid_spec=pltpu.PrefetchScalarGridSpec(
            num_scalar_prefetch=0,
            grid=(steps,),
            in_specs=[in_spec, in_spec],
            out_specs=pl.BlockSpec((8, _LANE), lambda i: (0, 0)),
        ),
        compiler_params=pltpu.CompilerParams(
            dimension_semantics=("arbitrary",),
        ),
    )(xm, selm)

    # Single tiny cross-lane reduce over the (8, 128) partial sums.
    return jnp.sum(out)


def _reference_focal_loss(x, target, *, gamma, alpha, size_average):
    logp = x.reshape(-1, 2).astype(jnp.float32)
    tgt = target.reshape(-1).astype(jnp.int32)
    logpt = jnp.take_along_axis(logp, tgt[:, None], axis=1)[:, 0]
    pt = jnp.exp(logpt)
    if isinstance(alpha, (float, int)) and not isinstance(alpha, bool):
        avec = jnp.array([alpha, 1.0 - alpha], jnp.float32)
        logpt = logpt * avec[tgt]
    elif isinstance(alpha, (list, tuple)):
        avec = jnp.array(alpha, jnp.float32)
        logpt = logpt * avec[tgt]
    loss = -1.0 * (1.0 - pt) ** gamma * logpt
    return loss.mean() if size_average else loss.sum()


if __name__ == "__main__":
    key = jax.random.PRNGKey(0)
    k1, k2 = jax.random.split(key)

    # NCHW log-probability input; 2048 elements -> 1024 (class0, class1) pairs
    B, C, H, W = 2, 4, 16, 16
    x_raw = jax.random.normal(k1, (B, C, H, W), dtype=jnp.float32)
    # make values proper log-probs over the consecutive pairs (as the module assumes)
    x = jax.nn.log_softmax(x_raw.reshape(-1, 2), axis=-1).reshape(B, C, H, W)

    n_rows = (B * C * H * W) // 2
    target = jax.random.randint(k2, (n_rows,), 0, 2, dtype=jnp.int32)

    gamma, alpha = 2.0, 0.25
    out = focal_loss(x, target, gamma=gamma, alpha=alpha, size_average=True)
    out = jax.block_until_ready(out)

    ref = _reference_focal_loss(x, target, gamma=gamma, alpha=alpha,
                                size_average=True)
    assert jnp.allclose(out, ref, rtol=1e-5, atol=1e-6), (out, ref)

    # also exercise the default-gamma (pow(0,0)) path and sum reduction
    out0 = jax.block_until_ready(
        focal_loss(x, target, gamma=0.0, alpha=None, size_average=False))
    ref0 = _reference_focal_loss(x, target, gamma=0.0, alpha=None,
                                 size_average=False)
    assert jnp.allclose(out0, ref0, rtol=1e-5, atol=1e-5), (out0, ref0)

    print("KERNEL_OK")
</pallas_src>

<mosaic_0001>
module attributes {stable_mosaic.version = 11 : i64} {
  func.func @_focal_loss_kernel(%arg0: i32, %arg1: memref<32x128xf32, #tpu.memory_space<vmem>>, %arg2: memref<32x128xi8, #tpu.memory_space<vmem>>, %arg3: memref<8x128xf32, #tpu.memory_space<vmem>>) attributes {dimension_semantics = [#tpu.dimension_semantics<arbitrary>], iteration_bounds = array<i64: 1>, scalar_prefetch = 0 : i64, scratch_operands = 0 : i64, tpu.core_type = #tpu.core_type<tc>, window_params = [{transform_indices = @transform_0, window_bounds = array<i64: 32, 128>}, {transform_indices = @transform_1, window_bounds = array<i64: 32, 128>}, {pipeline_mode = #tpu.pipeline_mode<synchronous>, transform_indices = @transform_2, window_bounds = array<i64: 8, 128>}]} {
    %c0_i32 = arith.constant 0 : i32
    %0 = arith.cmpi eq, %arg0, %c0_i32 : i32
    %1 = arith.extui %0 : i1 to i32
    %c0_i32_0 = arith.constant 0 : i32
    %2 = arith.cmpi ne, %1, %c0_i32_0 : i32
    scf.if %2 {
      %cst_17 = arith.constant 0.000000e+00 : f32
      %47 = vector.broadcast %cst_17 : f32 to vector<8x128xf32>
      %c0_18 = arith.constant 0 : index
      %c0_19 = arith.constant 0 : index
      %48 = vector.load %arg3[%c0_18, %c0_19] : memref<8x128xf32, #tpu.memory_space<vmem>>, vector<8x128xf32>
      tpu.vector_store %arg3[%c0_18, %c0_19], %47 {strides = array<i32>} : memref<8x128xf32, #tpu.memory_space<vmem>>, vector<8x128xf32>,
    } else {
    }
    %c0 = arith.constant 0 : index
    %c0_1 = arith.constant 0 : index
    %3 = vector.load %arg1[%c0, %c0_1] : memref<32x128xf32, #tpu.memory_space<vmem>>, vector<32x128xf32>
    %c0_2 = arith.constant 0 : index
    %c0_3 = arith.constant 0 : index
    %4 = vector.load %arg2[%c0_2, %c0_3] : memref<32x128xi8, #tpu.memory_space<vmem>>, vector<32x128xi8>
    %c0_i8 = arith.constant 0 : i8
    %5 = vector.broadcast %c0_i8 : i8 to vector<32x128xi8>
    %6 = arith.cmpi ne, %4, %5 : vector<32x128xi8>
    %7 = math.exp %3 : vector<32x128xf32>
    %8 = tpu.iota {dimensions = array<i32: 1>} : vector<1x128xi32>
    %c2_i32 = arith.constant 2 : i32
    %c0_i32_4 = arith.constant 0 : i32
    %9 = arith.cmpi eq, %c2_i32, %c0_i32_4 : i32
    %c1_i32 = arith.constant 1 : i32
    %10 = arith.select %9, %c1_i32, %c2_i32 : i32
    %11 = vector.broadcast %10 : i32 to vector<1x128xi32>
    %12 = arith.remsi %8, %11 : vector<1x128xi32>
    %c0_i32_5 = arith.constant 0 : i32
    %13 = vector.broadcast %c0_i32_5 : i32 to vector<1x128xi32>
    %14 = arith.cmpi ne, %12, %13 : vector<1x128xi32>
    %c0_i32_6 = arith.constant 0 : i32
    %15 = vector.broadcast %c0_i32_6 : i32 to vector<1x128xi32>
    %16 = arith.cmpi slt, %12, %15 : vector<1x128xi32>
    %c0_i32_7 = arith.constant 0 : i32
    %17 = arith.cmpi slt, %10, %c0_i32_7 : i32
    %18 = vector.broadcast %17 : i1 to vector<1x128xi1>
    %19 = vector.broadcast %18 : vector<1x128xi1> to vector<1x128xi1>
    %20 = arith.xori %16, %19 : vector<1x128xi1>
    %21 = arith.andi %20, %14 : vector<1x128xi1>
    %22 = vector.broadcast %10 : i32 to vector<1x128xi32>
    %23 = arith.addi %12, %22 : vector<1x128xi32>
    %24 = arith.select %21, %23, %12 : vector<1x128xi1>, vector<1x128xi32>
    %25 = arith.sitofp %24 : vector<1x128xi32> to vector<1x128xf32>
    %cst = arith.constant 5.000000e-01 : f32
    %26 = vector.broadcast %cst : f32 to vector<1x128xf32>
    %27 = arith.mulf %25, %26 : vector<1x128xf32>
    %cst_8 = arith.constant 2.500000e-01 : f32
    %28 = vector.broadcast %cst_8 : f32 to vector<1x128xf32>
    %29 = arith.addf %28, %27 : vector<1x128xf32>
    %cst_9 = arith.constant 0.000000e+00 : f32
    %30 = vector.broadcast %cst_9 : f32 to vector<1x128xf32>
    %31 = arith.subf %30, %29 : vector<1x128xf32>
    %32 = vector.broadcast %31 : vector<1x128xf32> to vector<32x128xf32>
    %33 = arith.mulf %3, %32 : vector<32x128xf32>
    %cst_10 = arith.constant 1.000000e+00 : f32
    %34 = vector.broadcast %cst_10 : f32 to vector<32x128xf32>
    %35 = arith.subf %34, %7 : vector<32x128xf32>
    %36 = arith.mulf %35, %35 : vector<32x128xf32>
    %37 = arith.mulf %36, %33 : vector<32x128xf32>
    %c0_i32_11 = arith.constant 0 : i32
    %38 = arith.cmpi eq, %arg0, %c0_i32_11 : i32
    %39 = arith.extui %38 : i1 to i32
    %c0_i32_12 = arith.constant 0 : i32
    %40 = arith.cmpi ne, %39, %c0_i32_12 : i32
    scf.if %40 {
      %47 = tpu.iota {dimensions = array<i32: 0>} : vector<32x128xi32>
      %c32_i32 = arith.constant 32 : i32
      %48 = arith.muli %arg0, %c32_i32 : i32
      %49 = vector.broadcast %48 : i32 to vector<32x128xi32>
      %50 = arith.addi %47, %49 : vector<32x128xi32>
      %c16_i32 = arith.constant 16 : i32
      %51 = vector.broadcast %c16_i32 : i32 to vector<32x128xi32>
      %52 = arith.cmpi slt, %50, %51 : vector<32x128xi32>
      %53 = arith.andi %6, %52 : vector<32x128xi1>
      %cst_17 = arith.constant 0.000000e+00 : f32
      %54 = vector.broadcast %cst_17 : f32 to vector<32x128xf32>
      %55 = arith.select %53, %37, %54 : vector<32x128xi1>, vector<32x128xf32>
      %c0_18 = arith.constant 0 : index
      %c0_19 = arith.constant 0 : index
      %56 = vector.load %arg3[%c0_18, %c0_19] : memref<8x128xf32, #tpu.memory_space<vmem>>, vector<8x128xf32>
      %57 = vector.shape_cast %55 : vector<32x128xf32> to vector<4x8x128xf32>
      %cst_20 = arith.constant dense<0.000000e+00> : vector<8x128xf32>
      %58 = vector.multi_reduction <add>, %57, %cst_20 [0] : vector<4x8x128xf32> to vector<8x128xf32>
      %59 = arith.addf %56, %58 : vector<8x128xf32>
      %c0_21 = arith.constant 0 : index
      %c0_22 = arith.constant 0 : index
      %60 = vector.load %arg3[%c0_21, %c0_22] : memref<8x128xf32, #tpu.memory_space<vmem>>, vector<8x128xf32>
      tpu.vector_store %arg3[%c0_21, %c0_22], %59 {strides = array<i32>} : memref<8x128xf32, #tpu.memory_space<vmem>>, vector<8x128xf32>,
    } else {
    }
    %c0_i32_13 = arith.constant 0 : i32
    %41 = arith.cmpi ne, %arg0, %c0_i32_13 : i32
    %42 = arith.extui %41 : i1 to i32
    %c0_i32_14 = arith.constant 0 : i32
    %43 = arith.cmpi ne, %42, %c0_i32_14 : i32
    scf.if %43 {
      %cst_17 = arith.constant 0.000000e+00 : f32
      %47 = vector.broadcast %cst_17 : f32 to vector<32x128xf32>
      %48 = arith.select %6, %37, %47 : vector<32x128xi1>, vector<32x128xf32>
      %c0_18 = arith.constant 0 : index
      %c0_19 = arith.constant 0 : index
      %49 = vector.load %arg3[%c0_18, %c0_19] : memref<8x128xf32, #tpu.memory_space<vmem>>, vector<8x128xf32>
      %50 = vector.shape_cast %48 : vector<32x128xf32> to vector<4x8x128xf32>
      %cst_20 = arith.constant dense<0.000000e+00> : vector<8x128xf32>
      %51 = vector.multi_reduction <add>, %50, %cst_20 [0] : vector<4x8x128xf32> to vector<8x128xf32>
      %52 = arith.addf %49, %51 : vector<8x128xf32>
      %c0_21 = arith.constant 0 : index
      %c0_22 = arith.constant 0 : index
      %53 = vector.load %arg3[%c0_21, %c0_22] : memref<8x128xf32, #tpu.memory_space<vmem>>, vector<8x128xf32>
      tpu.vector_store %arg3[%c0_21, %c0_22], %52 {strides = array<i32>} : memref<8x128xf32, #tpu.memory_space<vmem>>, vector<8x128xf32>,
    } else {
    }
    %c0_i32_15 = arith.constant 0 : i32
    %44 = arith.cmpi eq, %arg0, %c0_i32_15 : i32
    %45 = arith.extui %44 : i1 to i32
    %c0_i32_16 = arith.constant 0 : i32
    %46 = arith.cmpi ne, %45, %c0_i32_16 : i32
    scf.if %46 {
      %c0_17 = arith.constant 0 : index
      %c0_18 = arith.constant 0 : index
      %47 = vector.load %arg3[%c0_17, %c0_18] : memref<8x128xf32, #tpu.memory_space<vmem>>, vector<8x128xf32>
      %cst_19 = arith.constant 9.765625E-4 : f32
      %48 = vector.broadcast %cst_19 : f32 to vector<8x128xf32>
      %49 = arith.mulf %47, %48 : vector<8x128xf32>
      %c0_20 = arith.constant 0 : index
      %c0_21 = arith.constant 0 : index
      %50 = vector.load %arg3[%c0_20, %c0_21] : memref<8x128xf32, #tpu.memory_space<vmem>>, vector<8x128xf32>
      tpu.vector_store %arg3[%c0_20, %c0_21], %49 {strides = array<i32>} : memref<8x128xf32, #tpu.memory_space<vmem>>, vector<8x128xf32>,
    } else {
    }
    return
  }
  func.func @transform_0(%arg0: i32) -> (i32, i32) {
    %c0_i32 = arith.constant 0 : i32
    %c0_i32_0 = arith.constant 0 : i32
    return %arg0, %c0_i32 : i32, i32
  }
  func.func @transform_1(%arg0: i32) -> (i32, i32) {
    %c0_i32 = arith.constant 0 : i32
    %c0_i32_0 = arith.constant 0 : i32
    return %arg0, %c0_i32 : i32, i32
  }
  func.func @transform_2(%arg0: i32) -> (i32, i32) {
    %c0_i32 = arith.constant 0 : i32
    %c0_i32_0 = arith.constant 0 : i32
    %c0_i32_1 = arith.constant 0 : i32
    return %c0_i32, %c0_i32_0 : i32, i32
  }
}

</mosaic_0001>

<bundles_post_ra>
// kernel: tpu_custom_call.1
= control target key start
LH: loop header
LB: loop body
LE: loop exit
PB: predicated region body
PF: predicated region fallthrough
CT: control target
= control target key end

     0   :  { %7 = vsyncpa [#allocation3], 0  ;;  %s358_s0 = inlined_call_operand.hbm [shape: f32[16,128], index: 0, kind: input, shape index: {}]   ;;  %s359_s1 = inlined_call_operand.hbm [shape: s8[16,128], index: 1, kind: input, shape index: {}]   ;;  %s360_s2 = inlined_call_operand.hbm [shape: f32[8,128], index: 2, kind: output, shape index: {}]  }
   0x1   :  { %8 = vsyncpa [#allocation6], 0 }
   0x2   :  { %9 = vsyncpa [#allocation4], 0 }
   0x3   :  { %13 = vsyncadd [#allocation3], 256  ;;  %s14_s11 = sshll.u32 %s358_s0, 4  ;;  %s316_s12 = smov [#allocation2]   ;;  %s15_s11 = int_to_ptr.hbm [resolvable:$true] %s14_s11 }
   0x4   :  { %s16_s13 = sshll.u32 %s316_s12, 4  ;;  %s317_s14 = smov 128   ;;  %s17_s13 = int_to_ptr.vmem [resolvable:$true] %s16_s13 }
   0x5   :  { %s318_s15 = smov 8  }
   0x6   :  { %22 = dma.hbm_to_vmem [thread:$0]  %s15_s11, 256, %s17_s13, [#allocation3], %s317_s14, %s317_s14, %s318_s15  }
   0x7   :  { %26 = vsyncadd [#allocation6], 64  ;;  %s27_s18 = sshll.u32 %s359_s1, 4  ;;  %s319_s19 = smov [#allocation5]   ;;  %s28_s18 = int_to_ptr.hbm [resolvable:$true] %s27_s18 }
   0x8   :  { %s29_s20 = sshll.u32 %s319_s19, 4  ;;  %s320_s21 = smov 32   ;;  %s30_s20 = int_to_ptr.vmem [resolvable:$true] %s29_s20 }
   0x9   :  { %s321_s22 = smov 2  }
   0xa   :  { %35 = dma.hbm_to_vmem [thread:$0]  %s28_s18, 64, %s30_s20, [#allocation6], %s320_s21, %s320_s21, %s321_s22  }
   0xb   :  { %310 = dma.done.wait [#allocation3], 512  }
   0xc   :  { %311 = vsyncadd [#allocation3], 4294966784 }
   0xd   :  { %312 = dma.done.wait [#allocation6], 128  }
   0xe   :  { %313 = vsyncadd [#allocation6], 4294967168  ;;  %v71_v0 = vlaneseq  ;;  %vm322_vm0 = vmmov 1   ;;  %v323_v2 = vmov 0   ;;  %vm324_vm2 = vmmov 0   ;;  %v51_v9 = vld [vmem:[#allocation2] sm:$0xff] }
   0xf   :  { %vm123_vm1 = vmpackc.low %vm322_vm0, %vm322_vm0  ;;  %v52_v10 = vld [vmem:[#allocation2 + $0x8] sm:$0xff]  ;;  %v53_v11 = vld [vmem:[#allocation2 + $0x10] sm:$0xff]  ;;  %v63_v19 = vmul.f32 1.442695, %v51_v9  ;;  %s325_s0 = smov [#allocation7]   ;;  %s208_s25 = sshll.u32 %s360_s2, 4  ;;  %s209_s25 = int_to_ptr.hbm [resolvable:$true] %s208_s25 }
  0x10   :  { %v72_v1 = vand.u32 127, %v71_v0  ;;  %v124_v3 = vsel %vm123_vm1, 16711935, %v323_v2  ;;  %vm133_vm3 = vmpackc.low %vm324_vm2, %vm324_vm2  ;;  %v54_v12 = vld [vmem:[#allocation2 + $0x18] sm:$0xff]  ;;  %v55_v13 = vld [vmem:[#allocation5] sm:$0x3] }
  0x11   :  { %v134_v4 = vsel %vm133_vm3, 16711935, %v323_v2  ;;  %v126_v6 = vpack.c.b8 %v124_v3, %v124_v3  ;;  %v56_v14 = vld [vmem:[#allocation5 + $0x2] sm:$0x3]  ;;  %v57_v17 = vld [vmem:[#allocation5 + $0x4] sm:$0x3]  ;;  %vm59_vm5 = vnez %v55_v13  ;;  %230 = vpow2.f32 %v63_v19 }
  0x12   :  { %v77_v5 = vand.u32 1, %v72_v1  ;;  %v136_v8 = vpack.c.b8 %v134_v4, %v134_v4  ;;  %v58_v18 = vld [vmem:[#allocation5 + $0x6] sm:$0x3]  ;;  %vm60_vm6 = vnez %v56_v14  ;;  %vm61_vm7 = vnez %v57_v17  ;;  %s206_s1 = sshll.u32 %s325_s0, 4  ;;  %s207_s1 = int_to_ptr.vmem [resolvable:$true] %s206_s1 }
  0x13   :  { %vm347_vm4 = vnez %v126_v6  ;;  %v65_v20 = vmul.f32 1.442695, %v52_v10  ;;  %v67_v21 = vmul.f32 1.442695, %v53_v11  ;;  %vm62_vm9 = vnez %v58_v18 }
  0x14   :  { %v85_v7 = vcvt.s32.f32 %v77_v5  ;;  %vm137_vm8 = vnez %v136_v8  ;;  %v69_v22 = vmul.f32 1.442695, %v54_v12  ;;  %vm143_vm10 = vmand %vm59_vm5, %vm347_vm4 }
  0x15   :  { %232 = vpow2.f32 %v65_v20  ;;  %vm144_vm11 = vmand %vm60_vm6, %vm347_vm4  ;;  %v147_v25 = vsel %vm143_vm10, 16843009, %v323_v2 }
  0x16   :  { %v86_v15 = vmul.f32 0.5, %v85_v7  ;;  %234 = vpow2.f32 %v67_v21  ;;  %vm145_vm12 = vmand %vm61_vm7, %vm137_vm8  ;;  %v148_v26 = vsel %vm144_vm11, 16843009, %v323_v2  ;;  %v151_v30 = vunpack.c.0.s8 %v147_v25 }
  0x17   :  { %236 = vpow2.f32 %v69_v22  ;;  %vm146_vm13 = vmand %vm62_vm9, %vm137_vm8  ;;  %v149_v27 = vsel %vm145_vm12, 16843009, %v323_v2  ;;  %v231_v28 = vpop.eup %230  ;;  %v152_v34 = vunpack.c.0.s8 %v148_v26 }
  0x18   :  { %v87_v23 = vadd.f32 0.25, %v86_v15  ;;  %v150_v29 = vsel %vm146_vm13, 16843009, %v323_v2  ;;  %v93_v33 = vsub.f32 1.0, %v231_v28  ;;  %v153_v38 = vunpack.c.0.s8 %v149_v27 }
  0x19   :  { %v154_v43 = vunpack.c.0.s8 %v150_v29  ;;  %vm155_vm14 = vcmp.ne.s32.totalorder %v151_v30, 0  ;;  %vm156_vm15 = vcmp.ne.s32.totalorder %v152_v34, 0 }
  0x1a   :  { %v88_v24 = vsub.f32 0.0, %v87_v23  ;;  %v97_v42 = vmul.f32 %v93_v33, %v93_v33  ;;  %vm157_vm0 = vcmp.ne.s32.totalorder %v153_v38, 0 }
  0x1b   :  { %v233_v31 = vpop.eup %232  ;;  %vm158_vm1 = vcmp.ne.s32.totalorder %v154_v43, 0 }
  0x1c   :  { %v89_v32 = vmul.f32 %v88_v24, %v51_v9  ;;  %v235_v35 = vpop.eup %234  ;;  %v90_v36 = vmul.f32 %v88_v24, %v52_v10  ;;  %v94_v37 = vsub.f32 1.0, %v233_v31  ;;  %v91_v40 = vmul.f32 %v88_v24, %v53_v11 }
  0x1d   :  { %v237_v39 = vpop.eup %236  ;;  %v95_v41 = vsub.f32 1.0, %v235_v35  ;;  %v92_v44 = vmul.f32 %v88_v24, %v54_v12 }
  0x1e   :  { %v96_v45 = vsub.f32 1.0, %v237_v39  ;;  %v98_v46 = vmul.f32 %v94_v37, %v94_v37  ;;  %v101_v48 = vmul.f32 %v97_v42, %v89_v32 }
  0x1f   :  { %v99_v47 = vmul.f32 %v95_v41, %v95_v41 }
  0x20   :  { %v100_v49 = vmul.f32 %v96_v45, %v96_v45  ;;  %v102_v50 = vmul.f32 %v98_v46, %v90_v36  ;;  %v159_v52 = vsel %vm155_vm14, %v101_v48, 0.0 }
  0x21   :  { %v103_v51 = vmul.f32 %v99_v47, %v91_v40 }
  0x22   :  { %v104_v53 = vmul.f32 %v100_v49, %v92_v44  ;;  %v160_v54 = vsel %vm156_vm15, %v102_v50, 0.0 }
  0x23   :  { %v161_v55 = vsel %vm157_vm0, %v103_v51, 0.0  ;;  %v164_v56 = vadd.f32 %v160_v54, %v159_v52 }
  0x24   :  { %v162_v57 = vsel %vm158_vm1, %v104_v53, 0.0 }
  0x25   :  { %v165_v58 = vadd.f32 %v164_v56, %v161_v55 }
  0x27   :  { %v166_v59 = vadd.f32 %v165_v58, %v162_v57 }
  0x29   :  { %v199_v60 = vmul.f32 0.0009765625, %v166_v59 }
  0x2b   :  { %200 = vst [vmem:[#allocation7] sm:$0xff] %v199_v60 }
  0x2c   :  { %211 = dma.vmem_to_hbm [thread:$0]  %s207_s1, 128, %s209_s25, [#allocation4]  }
  0x2d   :  { %314 = dma.done.wait [#allocation4], 128  }
  0x2e   :  { %315 = vsyncadd [#allocation4], 4294967168 }
  0x2f   :  { %216 = vsyncpa [#allocation3], 1 }
  0x30   :  { %217 = vsyncpa [#allocation6], 1 }
  0x31   :  { %218 = vsyncpa [#allocation4], 1 }

</bundles_post_ra>
